<compile_context>
chip_gen: v5e
topology: v5e:2x2
jax: 0.10.0
libtpu: 0.0.40
codegen_flags: <defaults>
</compile_context>

<pallas_src>
import functools

import jax
import jax.numpy as jnp
from jax.experimental import pallas as pl
from jax.experimental.pallas import tpu as pltpu


# Rows of the packed vector slab (each row: mu values in [0,P), log values in [P,2P)).
_B1, _B2, _B3, _G1, _G2, _BE1, _BE2 = 0, 1, 2, 3, 4, 5, 6
_VEC_ROWS = 8  # padded to a full sublane group


# ----------------------------- Pallas kernel -------------------------------

def _encoder_kernel(a_ref, x_ref, w_ref, v_ref, out_ref):
    """Single fused body: both branches computed lane-fused in one (N, 2P) activation.

    a_ref  : (N, N)      normalized adjacency, bf16
    x_ref  : (N, P)      node features, zero-padded to P lanes, bf16
    w_ref  : (3, 2P, 2P) packed, zero-padded weights, bf16
    v_ref  : (8, 2P)     packed bias/gamma/beta rows, f32
    out_ref: (N, P)      lane-dense output slab: mu latent in [0,L), log in [L,2L)
    """
    n, p = out_ref.shape            # p  = per-branch padded width (128)
    p2 = w_ref.shape[-1]            # 2p = fused width
    px = x_ref.shape[-1]            # padded input width (= p)

    a = a_ref[...]                  # (n, n) bf16

    # lanes [0, p): mu branch, lanes [p, 2p): log branch
    is_mu = jax.lax.broadcasted_iota(jnp.int32, (1, p2), 1) < p

    def vrow(i):                    # static slice -> (1, p2) f32
        return v_ref[i:i + 1, :]

    def gcn(h_bf16, w_bf16, bias):
        # GCNConv: A_hat @ (h @ W) + b ; bf16 operands, f32 MXU accumulation.
        hw = jnp.dot(h_bf16, w_bf16, preferred_element_type=jnp.float32)
        ah = jnp.dot(a, hw.astype(jnp.bfloat16), preferred_element_type=jnp.float32)
        return ah + bias

    def bn(h, g_row, be_row):
        # BatchNorm1d training mode: biased batch stats over the node axis, one pass.
        inv_n = 1.0 / n
        mean = jnp.sum(h, axis=0, keepdims=True) * inv_n
        var = jnp.sum(h * h, axis=0, keepdims=True) * inv_n - mean * mean
        return (h - mean) * jax.lax.rsqrt(var + 1e-5) * vrow(g_row) + vrow(be_row)

    def fused_block(g, g_row, be_row):
        # mu lanes: BN -> ReLU ; log lanes: ReLU -> BN  (branch-free whole-tile selects)
        pre = jnp.where(is_mu, g, jnp.maximum(g, 0.0))
        normed = bn(pre, g_row, be_row)
        h = jnp.where(is_mu, jnp.maximum(normed, 0.0), normed)
        return h.astype(jnp.bfloat16)

    w0 = w_ref[0]
    w1 = w_ref[1]
    w2 = w_ref[2]

    h = fused_block(gcn(x_ref[...], w0[:px, :], vrow(_B1)), _G1, _BE1)
    h = fused_block(gcn(h, w1, vrow(_B2)), _G2, _BE2)
    # Layer-3 weights already pack mu latent into cols [0, L) and log latent into
    # [L, 2L), so only the first p output lanes are needed -> one (n, p) slab.
    out_ref[...] = gcn(h, w2[:, :p], vrow(_B3)[:, :p])


@functools.partial(jax.jit, static_argnames=("latent_dim",))
def encoder_forward(a_hat, x, w_slab, vec_slab, latent_dim):
    """Fused forward of both encoder branches. Returns (mu, log)."""
    n = x.shape[0]
    p2 = w_slab.shape[-1]
    p = p2 // 2

    a_bf = a_hat.astype(jnp.bfloat16)
    x_pad = jnp.pad(x, ((0, 0), (0, p - x.shape[1]))).astype(jnp.bfloat16)

    out = pl.pallas_call(
        _encoder_kernel,
        out_shape=jax.ShapeDtypeStruct((n, p), jnp.float32),
        compiler_params=pltpu.CompilerParams(vmem_limit_bytes=32 * 1024 * 1024),
    )(a_bf, x_pad, w_slab, vec_slab)

    return out[:, :latent_dim], out[:, latent_dim:2 * latent_dim]


# ------------------------------- JAX glue -----------------------------------

def gcn_normalized_adjacency(edge_index, num_nodes):
    """Dense A_hat = D^{-1/2}(A + I)D^{-1/2}. Duplicate edges sum; explicit self-loop
    edges are dropped and replaced with weight-1 self-loops."""
    src, dst = edge_index[0], edge_index[1]
    w = jnp.where(src == dst, 0.0, 1.0)               # drop explicit self-loops
    a = jnp.zeros((num_nodes, num_nodes), jnp.float32)
    a = a.at[dst, src].add(w)                         # scatter-add (multi-edges sum)
    a = a + jnp.eye(num_nodes, dtype=jnp.float32)     # self-loops, weight 1
    deg = jnp.sum(a, axis=1)
    dinv = jnp.where(deg > 0, jax.lax.rsqrt(deg), 0.0)
    return a * dinv[:, None] * dinv[None, :]


def init_branch_params(key, input_dim, latent_dim, capacity):
    """GCNConv: glorot weight, zero bias. BatchNorm1d: gamma=1, beta=0."""
    h1 = input_dim * capacity
    h2 = input_dim * capacity * 2
    dims = [(input_dim, h1), (h1, h2), (h2, latent_dim)]
    keys = jax.random.split(key, 3)

    def glorot(k, fan_in, fan_out):
        limit = (6.0 / (fan_in + fan_out)) ** 0.5
        return jax.random.uniform(k, (fan_in, fan_out), jnp.float32, -limit, limit)

    p = {}
    for idx, (k, (fi, fo)) in enumerate(zip(keys, dims), start=1):
        p[f"w{idx}"] = glorot(k, fi, fo)
        p[f"b{idx}"] = jnp.zeros((1, fo), jnp.float32)
    p["g1"], p["be1"] = jnp.ones((1, h1), jnp.float32), jnp.zeros((1, h1), jnp.float32)
    p["g2"], p["be2"] = jnp.ones((1, h2), jnp.float32), jnp.zeros((1, h2), jnp.float32)
    return p


def packed_width(input_dim, latent_dim, capacity):
    h1 = input_dim * capacity
    h2 = input_dim * capacity * 2
    f_max = max(input_dim, h1, h2, 2 * latent_dim)
    return max(128, ((f_max + 127) // 128) * 128)


def pack_encoder_params(params_mu, params_log, input_dim, latent_dim, capacity, pad_width):
    """Pack BOTH branches into one lane-fused (3, 2P, 2P) bf16 weight slab and one
    (8, 2P) f32 vector slab.  mu occupies lanes [0, P), log occupies [P, 2P);
    the final layer packs mu latent into cols [0, L) and log latent into [L, 2L)."""
    P = pad_width
    h1 = input_dim * capacity
    h2 = input_dim * capacity * 2
    L = latent_dim
    assert max(input_dim, h1, h2, 2 * L) <= P

    w = jnp.zeros((3, 2 * P, 2 * P), jnp.float32)
    # Layer 0: shared input rows [0, input_dim); mu out cols [0,h1), log out cols [P,P+h1)
    w = w.at[0, :input_dim, :h1].set(params_mu["w1"])
    w = w.at[0, :input_dim, P:P + h1].set(params_log["w1"])
    # Layer 1: block diagonal
    w = w.at[1, :h1, :h2].set(params_mu["w2"])
    w = w.at[1, P:P + h1, P:P + h2].set(params_log["w2"])
    # Layer 2: packed output — mu -> cols [0,L), log -> cols [L,2L)
    w = w.at[2, :h2, :L].set(params_mu["w3"])
    w = w.at[2, P:P + h2, L:2 * L].set(params_log["w3"])

    v = jnp.zeros((_VEC_ROWS, 2 * P), jnp.float32)

    def setv(v, row, mu_vals, log_vals, log_off):
        mu_vals = mu_vals.reshape(-1)
        log_vals = log_vals.reshape(-1)
        v = v.at[row, :mu_vals.size].set(mu_vals)
        v = v.at[row, log_off:log_off + log_vals.size].set(log_vals)
        return v

    v = setv(v, _B1, params_mu["b1"], params_log["b1"], P)
    v = setv(v, _B2, params_mu["b2"], params_log["b2"], P)
    v = setv(v, _B3, params_mu["b3"], params_log["b3"], L)     # packed layout in [0, 2L)
    v = setv(v, _G1, params_mu["g1"], params_log["g1"], P)
    v = setv(v, _G2, params_mu["g2"], params_log["g2"], P)
    v = setv(v, _BE1, params_mu["be1"], params_log["be1"], P)
    v = setv(v, _BE2, params_mu["be2"], params_log["be2"], P)

    return w.astype(jnp.bfloat16), v


# Pure-JAX f32 reference (same math, unpadded) for correctness checking.
def _branch_reference(a_hat, x, p, bn_first):
    def gcn(h, w, b):
        return a_hat @ (h @ w) + b

    def bn(h, g, be):
        m = jnp.mean(h, axis=0, keepdims=True)
        v = jnp.mean((h - m) ** 2, axis=0, keepdims=True)
        return (h - m) * jax.lax.rsqrt(v + 1e-5) * g + be

    h = gcn(x, p["w1"], p["b1"])
    h = jnp.maximum(bn(h, p["g1"], p["be1"]), 0.0) if bn_first else bn(jnp.maximum(h, 0.0), p["g1"], p["be1"])
    h = gcn(h, p["w2"], p["b2"])
    h = jnp.maximum(bn(h, p["g2"], p["be2"]), 0.0) if bn_first else bn(jnp.maximum(h, 0.0), p["g2"], p["be2"])
    return gcn(h, p["w3"], p["b3"])


# --------------------------------- main --------------------------------------

if __name__ == "__main__":
    N = 16
    INPUT_DIM = 8
    LATENT_DIM = 4
    CAPACITY = 2          # params['capacity']
    NUM_EDGES = 24

    root = jax.random.PRNGKey(0)
    k_x, k_src, k_dst, k_mu, k_log = jax.random.split(root, 5)

    x = jax.random.normal(k_x, (N, INPUT_DIM), jnp.float32)
    edge_index = jnp.stack([
        jax.random.randint(k_src, (NUM_EDGES,), 0, N),
        jax.random.randint(k_dst, (NUM_EDGES,), 0, N),
    ])                                                     # (2, E) like PyG

    a_hat = gcn_normalized_adjacency(edge_index, N)

    params_mu = init_branch_params(k_mu, INPUT_DIM, LATENT_DIM, CAPACITY)
    params_log = init_branch_params(k_log, INPUT_DIM, LATENT_DIM, CAPACITY)

    P = packed_width(INPUT_DIM, LATENT_DIM, CAPACITY)
    w_slab, vec_slab = pack_encoder_params(params_mu, params_log,
                                           INPUT_DIM, LATENT_DIM, CAPACITY, P)

    mu, log = encoder_forward(a_hat, x, w_slab, vec_slab, LATENT_DIM)
    jax.block_until_ready((mu, log))

    assert mu.shape == (N, LATENT_DIM) and log.shape == (N, LATENT_DIM)
    assert bool(jnp.all(jnp.isfinite(mu))) and bool(jnp.all(jnp.isfinite(log)))

    # Verify against the pure-JAX f32 reference of the PyTorch forward
    # (kernel uses bf16 MXU operands -> tolerance sized for bf16 error).
    ref_mu = _branch_reference(a_hat, x, params_mu, bn_first=True)
    ref_log = _branch_reference(a_hat, x, params_log, bn_first=False)
    assert bool(jnp.allclose(mu, ref_mu, rtol=5e-2, atol=5e-2))
    assert bool(jnp.allclose(log, ref_log, rtol=5e-2, atol=5e-2))

    print("KERNEL_OK")
</pallas_src>

<mosaic_0001>
module attributes {stable_mosaic.version = 11 : i64} {
  func.func @_encoder_kernel(%arg0: memref<16x16xbf16, #tpu.memory_space<vmem>>, %arg1: memref<16x128xbf16, #tpu.memory_space<vmem>>, %arg2: memref<3x256x256xbf16, #tpu.memory_space<vmem>>, %arg3: memref<8x256xf32, #tpu.memory_space<vmem>>, %arg4: memref<16x128xf32, #tpu.memory_space<vmem>>) attributes {dimension_semantics = [], scalar_prefetch = 0 : i64, scratch_operands = 0 : i64, tpu.core_type = #tpu.core_type<tc>} {
    %c0 = arith.constant 0 : index
    %c0_0 = arith.constant 0 : index
    %0 = vector.load %arg0[%c0, %c0_0] : memref<16x16xbf16, #tpu.memory_space<vmem>>, vector<16x16xbf16>
    %1 = tpu.iota {dimensions = array<i32: 1>} : vector<1x256xi32>
    %c128_i32 = arith.constant 128 : i32
    %2 = vector.broadcast %c128_i32 : i32 to vector<1x256xi32>
    %3 = arith.cmpi slt, %1, %2 : vector<1x256xi32>
    %c0_1 = arith.constant 0 : index
    %c0_2 = arith.constant 0 : index
    %c0_3 = arith.constant 0 : index
    %4 = vector.load %arg2[%c0_1, %c0_2, %c0_3] : memref<3x256x256xbf16, #tpu.memory_space<vmem>>, vector<1x256x256xbf16>
    %5 = vector.shape_cast %4 : vector<1x256x256xbf16> to vector<256x256xbf16>
    %c1 = arith.constant 1 : index
    %c0_4 = arith.constant 0 : index
    %c0_5 = arith.constant 0 : index
    %6 = vector.load %arg2[%c1, %c0_4, %c0_5] : memref<3x256x256xbf16, #tpu.memory_space<vmem>>, vector<1x256x256xbf16>
    %7 = vector.shape_cast %6 : vector<1x256x256xbf16> to vector<256x256xbf16>
    %c2 = arith.constant 2 : index
    %c0_6 = arith.constant 0 : index
    %c0_7 = arith.constant 0 : index
    %8 = vector.load %arg2[%c2, %c0_6, %c0_7] : memref<3x256x256xbf16, #tpu.memory_space<vmem>>, vector<1x256x256xbf16>
    %9 = vector.shape_cast %8 : vector<1x256x256xbf16> to vector<256x256xbf16>
    %c0_8 = arith.constant 0 : index
    %c0_9 = arith.constant 0 : index
    %10 = vector.load %arg1[%c0_8, %c0_9] : memref<16x128xbf16, #tpu.memory_space<vmem>>, vector<16x128xbf16>
    %11 = vector.extract_strided_slice %5 {offsets = [0, 0], sizes = [128, 256], strides = [1, 1]} : vector<256x256xbf16> to vector<128x256xbf16>
    %c0_10 = arith.constant 0 : index
    %c0_11 = arith.constant 0 : index
    %12 = vector.load %arg3[%c0_10, %c0_11] : memref<8x256xf32, #tpu.memory_space<vmem>>, vector<1x256xf32>
    %cst = arith.constant dense<0.000000e+00> : vector<16x256xf32>
    %13 = tpu.matmul %10, %11, %cst {dimension_numbers = #tpu.dot_dimension_numbers<[1], [0], [0], [1], [0, 0, 1, 1], [], []>} : vector<16x128xbf16>, vector<128x256xbf16>, vector<16x256xf32> -> vector<16x256xf32>
    %14 = arith.truncf %13 : vector<16x256xf32> to vector<16x256xbf16>
    %cst_12 = arith.constant dense<0.000000e+00> : vector<16x256xf32>
    %15 = tpu.matmul %0, %14, %cst_12 {dimension_numbers = #tpu.dot_dimension_numbers<[1], [0], [0], [1], [0, 0, 1, 1], [], []>} : vector<16x16xbf16>, vector<16x256xbf16>, vector<16x256xf32> -> vector<16x256xf32>
    %16 = vector.broadcast %12 : vector<1x256xf32> to vector<16x256xf32>
    %17 = arith.addf %15, %16 : vector<16x256xf32>
    %cst_13 = arith.constant 0.000000e+00 : f32
    %18 = vector.broadcast %cst_13 : f32 to vector<16x256xf32>
    %19 = arith.maximumf %17, %18 : vector<16x256xf32>
    %20 = vector.shape_cast %3 : vector<1x256xi1> to vector<1x256xi1>
    %21 = vector.broadcast %20 : vector<1x256xi1> to vector<16x256xi1>
    %22 = arith.select %21, %17, %19 : vector<16x256xi1>, vector<16x256xf32>
    %cst_14 = arith.constant dense<0.000000e+00> : vector<256xf32>
    %23 = vector.multi_reduction <add>, %22, %cst_14 [0] : vector<16x256xf32> to vector<256xf32>
    %24 = vector.shape_cast %23 : vector<256xf32> to vector<1x256xf32>
    %cst_15 = arith.constant 6.250000e-02 : f32
    %25 = vector.broadcast %cst_15 : f32 to vector<1x256xf32>
    %26 = arith.mulf %24, %25 : vector<1x256xf32>
    %27 = arith.mulf %22, %22 : vector<16x256xf32>
    %cst_16 = arith.constant dense<0.000000e+00> : vector<256xf32>
    %28 = vector.multi_reduction <add>, %27, %cst_16 [0] : vector<16x256xf32> to vector<256xf32>
    %29 = vector.shape_cast %28 : vector<256xf32> to vector<1x256xf32>
    %cst_17 = arith.constant 6.250000e-02 : f32
    %30 = vector.broadcast %cst_17 : f32 to vector<1x256xf32>
    %31 = arith.mulf %29, %30 : vector<1x256xf32>
    %32 = arith.mulf %26, %26 : vector<1x256xf32>
    %33 = arith.subf %31, %32 : vector<1x256xf32>
    %34 = vector.broadcast %26 : vector<1x256xf32> to vector<16x256xf32>
    %35 = arith.subf %22, %34 : vector<16x256xf32>
    %cst_18 = arith.constant 9.99999974E-6 : f32
    %36 = vector.broadcast %cst_18 : f32 to vector<1x256xf32>
    %37 = arith.addf %33, %36 : vector<1x256xf32>
    %38 = math.rsqrt %37 : vector<1x256xf32>
    %39 = vector.broadcast %38 : vector<1x256xf32> to vector<16x256xf32>
    %40 = arith.mulf %35, %39 : vector<16x256xf32>
    %c3 = arith.constant 3 : index
    %c0_19 = arith.constant 0 : index
    %41 = vector.load %arg3[%c3, %c0_19] : memref<8x256xf32, #tpu.memory_space<vmem>>, vector<1x256xf32>
    %42 = vector.broadcast %41 : vector<1x256xf32> to vector<16x256xf32>
    %43 = arith.mulf %40, %42 : vector<16x256xf32>
    %c5 = arith.constant 5 : index
    %c0_20 = arith.constant 0 : index
    %44 = vector.load %arg3[%c5, %c0_20] : memref<8x256xf32, #tpu.memory_space<vmem>>, vector<1x256xf32>
    %45 = vector.broadcast %44 : vector<1x256xf32> to vector<16x256xf32>
    %46 = arith.addf %43, %45 : vector<16x256xf32>
    %cst_21 = arith.constant 0.000000e+00 : f32
    %47 = vector.broadcast %cst_21 : f32 to vector<16x256xf32>
    %48 = arith.maximumf %46, %47 : vector<16x256xf32>
    %49 = vector.shape_cast %3 : vector<1x256xi1> to vector<1x256xi1>
    %50 = vector.broadcast %49 : vector<1x256xi1> to vector<16x256xi1>
    %51 = arith.select %50, %48, %46 : vector<16x256xi1>, vector<16x256xf32>
    %52 = arith.truncf %51 : vector<16x256xf32> to vector<16x256xbf16>
    %c1_22 = arith.constant 1 : index
    %c0_23 = arith.constant 0 : index
    %53 = vector.load %arg3[%c1_22, %c0_23] : memref<8x256xf32, #tpu.memory_space<vmem>>, vector<1x256xf32>
    %cst_24 = arith.constant dense<0.000000e+00> : vector<16x256xf32>
    %54 = tpu.matmul %52, %7, %cst_24 {dimension_numbers = #tpu.dot_dimension_numbers<[1], [0], [0], [1], [0, 0, 1, 1], [], []>} : vector<16x256xbf16>, vector<256x256xbf16>, vector<16x256xf32> -> vector<16x256xf32>
    %55 = arith.truncf %54 : vector<16x256xf32> to vector<16x256xbf16>
    %cst_25 = arith.constant dense<0.000000e+00> : vector<16x256xf32>
    %56 = tpu.matmul %0, %55, %cst_25 {dimension_numbers = #tpu.dot_dimension_numbers<[1], [0], [0], [1], [0, 0, 1, 1], [], []>} : vector<16x16xbf16>, vector<16x256xbf16>, vector<16x256xf32> -> vector<16x256xf32>
    %57 = vector.broadcast %53 : vector<1x256xf32> to vector<16x256xf32>
    %58 = arith.addf %56, %57 : vector<16x256xf32>
    %cst_26 = arith.constant 0.000000e+00 : f32
    %59 = vector.broadcast %cst_26 : f32 to vector<16x256xf32>
    %60 = arith.maximumf %58, %59 : vector<16x256xf32>
    %61 = vector.shape_cast %3 : vector<1x256xi1> to vector<1x256xi1>
    %62 = vector.broadcast %61 : vector<1x256xi1> to vector<16x256xi1>
    %63 = arith.select %62, %58, %60 : vector<16x256xi1>, vector<16x256xf32>
    %cst_27 = arith.constant dense<0.000000e+00> : vector<256xf32>
    %64 = vector.multi_reduction <add>, %63, %cst_27 [0] : vector<16x256xf32> to vector<256xf32>
    %65 = vector.shape_cast %64 : vector<256xf32> to vector<1x256xf32>
    %cst_28 = arith.constant 6.250000e-02 : f32
    %66 = vector.broadcast %cst_28 : f32 to vector<1x256xf32>
    %67 = arith.mulf %65, %66 : vector<1x256xf32>
    %68 = arith.mulf %63, %63 : vector<16x256xf32>
    %cst_29 = arith.constant dense<0.000000e+00> : vector<256xf32>
    %69 = vector.multi_reduction <add>, %68, %cst_29 [0] : vector<16x256xf32> to vector<256xf32>
    %70 = vector.shape_cast %69 : vector<256xf32> to vector<1x256xf32>
    %cst_30 = arith.constant 6.250000e-02 : f32
    %71 = vector.broadcast %cst_30 : f32 to vector<1x256xf32>
    %72 = arith.mulf %70, %71 : vector<1x256xf32>
    %73 = arith.mulf %67, %67 : vector<1x256xf32>
    %74 = arith.subf %72, %73 : vector<1x256xf32>
    %75 = vector.broadcast %67 : vector<1x256xf32> to vector<16x256xf32>
    %76 = arith.subf %63, %75 : vector<16x256xf32>
    %cst_31 = arith.constant 9.99999974E-6 : f32
    %77 = vector.broadcast %cst_31 : f32 to vector<1x256xf32>
    %78 = arith.addf %74, %77 : vector<1x256xf32>
    %79 = math.rsqrt %78 : vector<1x256xf32>
    %80 = vector.broadcast %79 : vector<1x256xf32> to vector<16x256xf32>
    %81 = arith.mulf %76, %80 : vector<16x256xf32>
    %c4 = arith.constant 4 : index
    %c0_32 = arith.constant 0 : index
    %82 = vector.load %arg3[%c4, %c0_32] : memref<8x256xf32, #tpu.memory_space<vmem>>, vector<1x256xf32>
    %83 = vector.broadcast %82 : vector<1x256xf32> to vector<16x256xf32>
    %84 = arith.mulf %81, %83 : vector<16x256xf32>
    %c6 = arith.constant 6 : index
    %c0_33 = arith.constant 0 : index
    %85 = vector.load %arg3[%c6, %c0_33] : memref<8x256xf32, #tpu.memory_space<vmem>>, vector<1x256xf32>
    %86 = vector.broadcast %85 : vector<1x256xf32> to vector<16x256xf32>
    %87 = arith.addf %84, %86 : vector<16x256xf32>
    %cst_34 = arith.constant 0.000000e+00 : f32
    %88 = vector.broadcast %cst_34 : f32 to vector<16x256xf32>
    %89 = arith.maximumf %87, %88 : vector<16x256xf32>
    %90 = vector.shape_cast %3 : vector<1x256xi1> to vector<1x256xi1>
    %91 = vector.broadcast %90 : vector<1x256xi1> to vector<16x256xi1>
    %92 = arith.select %91, %89, %87 : vector<16x256xi1>, vector<16x256xf32>
    %93 = arith.truncf %92 : vector<16x256xf32> to vector<16x256xbf16>
    %94 = vector.extract_strided_slice %9 {offsets = [0, 0], sizes = [256, 128], strides = [1, 1]} : vector<256x256xbf16> to vector<256x128xbf16>
    %c2_35 = arith.constant 2 : index
    %c0_36 = arith.constant 0 : index
    %95 = vector.load %arg3[%c2_35, %c0_36] : memref<8x256xf32, #tpu.memory_space<vmem>>, vector<1x256xf32>
    %96 = vector.extract_strided_slice %95 {offsets = [0, 0], sizes = [1, 128], strides = [1, 1]} : vector<1x256xf32> to vector<1x128xf32>
    %cst_37 = arith.constant dense<0.000000e+00> : vector<16x128xf32>
    %97 = tpu.matmul %93, %94, %cst_37 {dimension_numbers = #tpu.dot_dimension_numbers<[1], [0], [0], [1], [0, 0, 1, 1], [], []>} : vector<16x256xbf16>, vector<256x128xbf16>, vector<16x128xf32> -> vector<16x128xf32>
    %98 = arith.truncf %97 : vector<16x128xf32> to vector<16x128xbf16>
    %cst_38 = arith.constant dense<0.000000e+00> : vector<16x128xf32>
    %99 = tpu.matmul %0, %98, %cst_38 {dimension_numbers = #tpu.dot_dimension_numbers<[1], [0], [0], [1], [0, 0, 1, 1], [], []>} : vector<16x16xbf16>, vector<16x128xbf16>, vector<16x128xf32> -> vector<16x128xf32>
    %100 = vector.broadcast %96 : vector<1x128xf32> to vector<16x128xf32>
    %101 = arith.addf %99, %100 : vector<16x128xf32>
    %c0_39 = arith.constant 0 : index
    %c0_40 = arith.constant 0 : index
    %102 = vector.load %arg4[%c0_39, %c0_40] : memref<16x128xf32, #tpu.memory_space<vmem>>, vector<16x128xf32>
    tpu.vector_store %arg4[%c0_39, %c0_40], %101 {strides = array<i32>} : memref<16x128xf32, #tpu.memory_space<vmem>>, vector<16x128xf32>,
    return
  }
}

</mosaic_0001>

<bundles_post_ra>
// kernel: encoder_forward.1
= control target key start
LH: loop header
LB: loop body
LE: loop exit
PB: predicated region body
PF: predicated region fallthrough
CT: control target
= control target key end

     0   :  { %9 = vsyncpa [#allocation3], 0  ;;  %s1290_s18 = smov [#allocation2]   ;;  %s1291_s20 = smov 128   ;;  %s1424_s0 = inlined_call_operand.vmem [shape: bf16[16,16], index: 0, kind: input, shape index: {}]   ;;  %s1425_s1 = inlined_call_operand.vmem [shape: bf16[16,128], index: 1, kind: input, shape index: {}]   ;;  %s1426_s2 = inlined_call_operand.hbm [shape: bf16[3,256,256], index: 2, kind: input, shape index: {}]   ;;  %s1427_s3 = inlined_call_operand.vmem [shape: f32[8,256], index: 3, kind: input, shape index: {}]   ;;  %s1428_s4 = inlined_call_operand.vmem [shape: f32[16,128], index: 4, kind: output, shape index: {}]  }
   0x1   :  { %s18_s17 = sshll.u32 %s1426_s2, 4  ;;  %s20_s19 = sshll.u32 %s1290_s18, 4  ;;  %s19_s17 = int_to_ptr.hbm [resolvable:$true] %s18_s17  ;;  %s21_s19 = int_to_ptr.vmem [resolvable:$true] %s20_s19 }
   0x2   :  { %s1292_s21 = smov 8  }
   0x3   :  { %26 = dma.hbm_to_vmem [thread:$0]  %s19_s17, 12288, %s21_s19, [#allocation3], %s1291_s20, %s1291_s20, %s1292_s21  }
   0x4   :  { %1288 = dma.done.wait [#allocation3], 12288  }
   0x5   :  { %1289 = vsyncadd [#allocation3], 4294955008  ;;  %v974_v0 = vld [vmem:[#allocation2 + $0x70] sm:$0xf]  ;;  %v1203_v1 = vld [vmem:[#allocation2 + $0x74] sm:$0xf0] }
   0x6   :  { %v1202_v2 = vld [vmem:[#allocation2 + $0x74] sm:$0xf]  ;;  %v975_v3 = vor.u32 %v1203_v1, %v974_v0  ;;  %v976_v4 = vld [vmem:[#allocation2 + $0x78] sm:$0xf0]  ;;  %v966_v5 = vld [vmem:[#allocation2 + $0x60] sm:$0xf] }
   0x7   :  { %v1201_v6 = vld [vmem:[#allocation2 + $0x64] sm:$0xf0]  ;;  %v979_v7 = vor.u32 %v1202_v2, %v976_v4  ;;  %v1200_v8 = vld [vmem:[#allocation2 + $0x64] sm:$0xf]  ;;  %v968_v9 = vld [vmem:[#allocation2 + $0x68] sm:$0xf0] }
   0x8   :  { %212 = vmatpush.bf16.msra.mxu0 %v975_v3  ;;  %v967_v10 = vor.u32 %v1201_v6, %v966_v5  ;;  %v971_v11 = vor.u32 %v1200_v8, %v968_v9  ;;  %v958_v12 = vld [vmem:[#allocation2 + $0x50] sm:$0xf]  ;;  %v1199_v13 = vld [vmem:[#allocation2 + $0x54] sm:$0xf0]  ;;  %v1198_v14 = vld [vmem:[#allocation2 + $0x54] sm:$0xf] }
   0x9   :  { %226 = vmatpush.bf16.msra.mxu1 %v979_v7  ;;  %v960_v15 = vld [vmem:[#allocation2 + $0x58] sm:$0xf0]  ;;  %v959_v16 = vor.u32 %v1199_v13, %v958_v12  ;;  %v950_v18 = vld [vmem:[#allocation2 + $0x40] sm:$0xf]  ;;  %v1197_v19 = vld [vmem:[#allocation2 + $0x44] sm:$0xf0] }
   0xa   :  { %v963_v17 = vor.u32 %v1198_v14, %v960_v15  ;;  %v1196_v20 = vld [vmem:[#allocation2 + $0x44] sm:$0xf]  ;;  %v952_v21 = vld [vmem:[#allocation2 + $0x48] sm:$0xf0]  ;;  %v951_v22 = vor.u32 %v1197_v19, %v950_v18  ;;  %v942_v24 = vld [vmem:[#allocation2 + $0x30] sm:$0xf] }
   0xb   :  { %v955_v23 = vor.u32 %v1196_v20, %v952_v21  ;;  %v1195_v25 = vld [vmem:[#allocation2 + $0x34] sm:$0xf0]  ;;  %v1194_v26 = vld [vmem:[#allocation2 + $0x34] sm:$0xf]  ;;  %v944_v27 = vld [vmem:[#allocation2 + $0x38] sm:$0xf0] }
   0xc   :  { %213 = vmatpush.bf16.msra.mxu0 %v967_v10  ;;  %v943_v28 = vor.u32 %v1195_v25, %v942_v24  ;;  %v947_v29 = vor.u32 %v1194_v26, %v944_v27  ;;  %v934_v30 = vld [vmem:[#allocation2 + $0x20] sm:$0xf]  ;;  %v1193_v31 = vld [vmem:[#allocation2 + $0x24] sm:$0xf0]  ;;  %v1192_v32 = vld [vmem:[#allocation2 + $0x24] sm:$0xf] }
   0xd   :  { %227 = vmatpush.bf16.msra.mxu1 %v971_v11  ;;  %v936_v33 = vld [vmem:[#allocation2 + $0x28] sm:$0xf0]  ;;  %v935_v34 = vor.u32 %v1193_v31, %v934_v30  ;;  %v926_v36 = vld [vmem:[#allocation2 + $0x10] sm:$0xf]  ;;  %v1191_v37 = vld [vmem:[#allocation2 + $0x14] sm:$0xf0] }
   0xe   :  { %v939_v35 = vor.u32 %v1192_v32, %v936_v33  ;;  %v1190_v38 = vld [vmem:[#allocation2 + $0x14] sm:$0xf]  ;;  %v928_v39 = vld [vmem:[#allocation2 + $0x18] sm:$0xf0]  ;;  %v927_v40 = vor.u32 %v1191_v37, %v926_v36  ;;  %v918_v42 = vld [vmem:[#allocation2] sm:$0xf] }
   0xf   :  { %v931_v41 = vor.u32 %v1190_v38, %v928_v39  ;;  %v1189_v43 = vld [vmem:[#allocation2 + $0x4] sm:$0xf0]  ;;  %v1188_v44 = vld [vmem:[#allocation2 + $0x4] sm:$0xf]  ;;  %v920_v45 = vld [vmem:[#allocation2 + $0x8] sm:$0xf0] }
  0x10   :  { %214 = vmatpush.bf16.msra.mxu0 %v959_v16  ;;  %v919_v46 = vor.u32 %v1189_v43, %v918_v42  ;;  %v923_v47 = vor.u32 %v1188_v44, %v920_v45  ;;  %v1252_v48 = vld [vmem:[%s1425_s1] sm:$0xff]  ;;  %vm252_vm0 = vcmask 130048   ;;  %v1047_v56 = vld [vmem:[#allocation2 + $0x170] sm:$0xf]  ;;  %v1219_v57 = vld [vmem:[#allocation2 + $0x174] sm:$0xf0] }
  0x11   :  { %228 = vmatpush.bf16.msra.mxu1 %v963_v17  ;;  %v1327_v55 = vld [vmem:[%s1424_s0] sm:$0xff]  ;;  %v1218_v58 = vld [vmem:[#allocation2 + $0x174] sm:$0xf]  ;;  %v1048_v59 = vor.u32 %v1219_v57, %v1047_v56  ;;  %v1049_v60 = vld [vmem:[#allocation2 + $0x178] sm:$0xf0] }
  0x12   :  { %v1336_v61 = vld [vmem:[%s1427_s3] ss:$8 sm:$0x3]  ;;  %v1052_v62 = vor.u32 %v1218_v58, %v1049_v60  ;;  %v1216_v2 = vld [vmem:[#allocation2 + $0x164] sm:$0xf] }
  0x13   :  { %560 = vmatpush.bf16.msra.mxu2 %v1048_v59  ;;  %v1039_v0 = vld [vmem:[#allocation2 + $0x160] sm:$0xf]  ;;  %v1217_v1 = vld [vmem:[#allocation2 + $0x164] sm:$0xf0]  ;;  %v243_v3 = vperm.slane %v1336_v61, 0 }
  0x14   :  { %215 = vmatpush.bf16.msra.mxu0 %v951_v22  ;;  %v1040_v4 = vor.u32 %v1217_v1, %v1039_v0  ;;  %v1041_v5 = vld [vmem:[#allocation2 + $0x168] sm:$0xf0]  ;;  %v1111_v7 = vld [vmem:[#allocation2 + $0x1f0] sm:$0xf]  ;;  %v1235_v8 = vld [vmem:[#allocation2 + $0x1f4] sm:$0xf0] }
  0x15   :  { %229 = vmatpush.bf16.msra.mxu1 %v955_v23  ;;  %v1044_v6 = vor.u32 %v1216_v2, %v1041_v5  ;;  %v1234_v9 = vld [vmem:[#allocation2 + $0x1f4] sm:$0xf]  ;;  %v1112_v10 = vor.u32 %v1235_v8, %v1111_v7  ;;  %v1113_v11 = vld [vmem:[#allocation2 + $0x1f8] sm:$0xf0]  ;;  %v1031_v13 = vld [vmem:[#allocation2 + $0x150] sm:$0xf] }
  0x16   :  { %v1116_v12 = vor.u32 %v1234_v9, %v1113_v11  ;;  %v1215_v14 = vld [vmem:[#allocation2 + $0x154] sm:$0xf0]  ;;  %v1214_v15 = vld [vmem:[#allocation2 + $0x154] sm:$0xf]  ;;  %v1033_v17 = vld [vmem:[#allocation2 + $0x158] sm:$0xf0] }
  0x17   :  { %561 = vmatpush.bf16.msra.mxu2 %v1040_v4  ;;  %v1032_v16 = vor.u32 %v1215_v14, %v1031_v13  ;;  %v1036_v19 = vor.u32 %v1214_v15, %v1033_v17  ;;  %v1103_v20 = vld [vmem:[#allocation2 + $0x1e0] sm:$0xf]  ;;  %v1233_v21 = vld [vmem:[#allocation2 + $0x1e4] sm:$0xf0]  ;;  %v1232_v22 = vld [vmem:[#allocation2 + $0x1e4] sm:$0xf] }
  0x18   :  { %216 = vmatpush.bf16.msra.mxu0 %v943_v28  ;;  %v244_v23 = vperm.slane %v1336_v61, 1  ;;  %v1104_v25 = vor.u32 %v1233_v21, %v1103_v20  ;;  %v1105_v26 = vld [vmem:[#allocation2 + $0x1e8] sm:$0xf0]  ;;  %v1213_v30 = vld [vmem:[#allocation2 + $0x144] sm:$0xf0] }
  0x19   :  { %230 = vmatpush.bf16.msra.mxu1 %v947_v29  ;;  %v1108_v28 = vor.u32 %v1232_v22, %v1105_v26  ;;  %v1023_v29 = vld [vmem:[#allocation2 + $0x140] sm:$0xf]  ;;  %v1212_v31 = vld [vmem:[#allocation2 + $0x144] sm:$0xf]  ;;  %v1095_v37 = vld [vmem:[#allocation2 + $0x1d0] sm:$0xf] }
  0x1a   :  { %v1024_v33 = vor.u32 %v1213_v30, %v1023_v29  ;;  %v1231_v38 = vld [vmem:[#allocation2 + $0x1d4] sm:$0xf0]  ;;  %v1230_v43 = vld [vmem:[#allocation2 + $0x1d4] sm:$0xf]  ;;  %v1097_v44 = vld [vmem:[#allocation2 + $0x1d8] sm:$0xf0] }
  0x1b   :  { %562 = vmatpush.bf16.msra.mxu2 %v1032_v16  ;;  %v1096_v42 = vor.u32 %v1231_v38, %v1095_v37  ;;  %v1100_v45 = vor.u32 %v1230_v43, %v1097_v44  ;;  %v1229_v56 = vld [vmem:[#allocation2 + $0x1c4] sm:$0xf0]  ;;  %v1228_v57 = vld [vmem:[#allocation2 + $0x1c4] sm:$0xf]  ;;  %v1007_v2 = vld [vmem:[#allocation2 + $0x120] sm:$0xf] }
  0x1c   :  { %217 = vmatpush.bf16.msra.mxu0 %v935_v34  ;;  %v1025_v34 = vld [vmem:[#allocation2 + $0x148] sm:$0xf0]  ;;  %v1208_v4 = vld [vmem:[#allocation2 + $0x124] sm:$0xf]  ;;  %v1079_v11 = vld [vmem:[#allocation2 + $0x1b0] sm:$0xf] }
  0x1d   :  { %231 = vmatpush.bf16.msra.mxu1 %v939_v35  ;;  %v1028_v36 = vor.u32 %v1212_v31, %v1025_v34  ;;  %v1009_v8 = vld [vmem:[#allocation2 + $0x128] sm:$0xf0]  ;;  %v1226_v16 = vld [vmem:[#allocation2 + $0x1b4] sm:$0xf]  ;;  %v1081_v17 = vld [vmem:[#allocation2 + $0x1b8] sm:$0xf0] }
  0x1e   :  { %v1084_v22 = vor.u32 %v1226_v16, %v1081_v17  ;;  %v1001_v29 = vld [vmem:[#allocation2 + $0x118] sm:$0xf0]  ;;  %v1071_v34 = vld [vmem:[#allocation2 + $0x1a0] sm:$0xf] }
  0x1f   :  { %563 = vmatpush.bf16.msra.mxu2 %v1024_v33  ;;  %v991_v44 = vld [vmem:[#allocation2 + $0x100] sm:$0xf] }
  0x20   :  { %218 = vmatpush.bf16.msra.mxu0 %v927_v40 }
  0x21   :  { %232 = vmatpush.bf16.msra.mxu1 %v931_v41 }
  0x24   :  { %219 = vmatpush.bf16.msra.mxu0 %v919_v46  ;;  %v1015_v46 = vld [vmem:[#allocation2 + $0x130] sm:$0xf] }
  0x25   :  { %233 = vmatpush.bf16.msra.mxu1 %v923_v47  ;;  %v1211_v47 = vld [vmem:[#allocation2 + $0x134] sm:$0xf0] }
  0x27   :  { %220 = vmatmul.bf16.vlgmr.msra.gmra.mxu0 %v1252_v48 }
  0x28   :  { %234 = vmatmul.bf16.vlgmr.msra.gmra.mxu1 %v1252_v48  ;;  %588 = vmatpush.bf16.msrb.mxu0 %v1052_v62  ;;  %v1210_v48 = vld [vmem:[#allocation2 + $0x134] sm:$0xf] }
  0x2c   :  { %589 = vmatpush.bf16.msrb.mxu0 %v1044_v6 }
  0x30   :  { %590 = vmatpush.bf16.msrb.mxu0 %v1036_v19 }
  0x34   :  { %591 = vmatpush.bf16.msrb.mxu0 %v1028_v36 }
  0xa4   :  { %v221_v49 = vpop.f32.mrf.mxu0 }
  0xa5   :  { %v235_v50 = vpop.f32.mrf.mxu1 }
  0xac   :  { %v223_v51 = vpop.f32.mrf.mxu0 }
  0xad   :  { %v240_v52 = vpack.c.bf16 %v223_v51, %v221_v49  ;;  %v237_v53 = vpop.f32.mrf.mxu1  ;;  %v1016_v51 = vor.u32 %v1211_v47, %v1015_v46 }
  0xae   :  { %v241_v54 = vpack.c.bf16 %v237_v53, %v235_v50 }
  0xaf   :  { %263 = vmatpush.bf16.msrb.mxu1 %v240_v52  ;;  %v1017_v52 = vld [vmem:[#allocation2 + $0x138] sm:$0xf0]  ;;  %564 = vmatpush.bf16.msra.mxu2 %v1016_v51 }
  0xb0   :  { %277 = vmatpush.bf16.msra.mxu3 %v241_v54  ;;  %v1020_v53 = vor.u32 %v1210_v48, %v1017_v52  ;;  %v1087_v54 = vld [vmem:[#allocation2 + $0x1c0] sm:$0xf] }
  0xb1   :  { %v1088_v62 = vor.u32 %v1229_v56, %v1087_v54  ;;  %v1063_v54 = vld [vmem:[#allocation2 + $0x190] sm:$0xf]  ;;  %v1223_v56 = vld [vmem:[#allocation2 + $0x194] sm:$0xf0] }
  0xb2   :  { %984 = vmatmul.msk.bf16.vlgmr.msrb.gmra.mxu1 %vm252_vm0, %v1327_v55  ;;  %592 = vmatpush.bf16.msrb.mxu0 %v1020_v53 }
  0xb3   :  { %985 = vmatmul.msk.bf16.vlgmr.msra.gmra.mxu3 %vm252_vm0, %v1327_v55  ;;  %602 = vmatpush.bf16.msra.mxu1 %v1116_v12  ;;  %v1227_v12 = vld [vmem:[#allocation2 + $0x1b4] sm:$0xf0] }
  0xb4   :  { %574 = vmatpush.bf16.msrb.mxu3 %v1112_v10  ;;  %v1012_v10 = vor.u32 %v1208_v4, %v1009_v8  ;;  %v1080_v15 = vor.u32 %v1227_v12, %v1079_v11  ;;  %v1221_v4 = vld [vmem:[#allocation2 + $0x184] sm:$0xf0]  ;;  %v1220_v8 = vld [vmem:[#allocation2 + $0x184] sm:$0xf] }
  0xb6   :  { %593 = vmatpush.bf16.msrb.mxu0 %v1012_v10  ;;  %v1057_v10 = vld [vmem:[#allocation2 + $0x188] sm:$0xf0] }
  0xb7   :  { %603 = vmatpush.bf16.msra.mxu1 %v1108_v28  ;;  %v1060_v12 = vor.u32 %v1220_v8, %v1057_v10 }
  0xb8   :  { %575 = vmatpush.bf16.msrb.mxu3 %v1104_v25  ;;  %v1206_v25 = vld [vmem:[#allocation2 + $0x114] sm:$0xf] }
  0xb9   :  { %v1004_v33 = vor.u32 %v1206_v25, %v1001_v29 }
  0xbb   :  { %604 = vmatpush.bf16.msra.mxu1 %v1100_v45  ;;  %594 = vmatpush.bf16.msrb.mxu0 %v1004_v33  ;;  %v1205_v45 = vld [vmem:[#allocation2 + $0x104] sm:$0xf0] }
  0xbc   :  { %576 = vmatpush.bf16.msrb.mxu3 %v1096_v42  ;;  %v992_v48 = vor.u32 %v1205_v45, %v991_v44 }
  0xc0   :  { %577 = vmatpush.bf16.msrb.mxu3 %v1088_v62  ;;  %v1065_v62 = vld [vmem:[#allocation2 + $0x198] sm:$0xf0] }
  0xc4   :  { %578 = vmatpush.bf16.msrb.mxu3 %v1080_v15 }
 0x12f   :  { %v265_v63 = vpop.f32.mrf.mxu1 }
 0x130   :  { %v1339_v18 = vadd.f32 %v265_v63, %v243_v3  ;;  %v1089_v63 = vld [vmem:[#allocation2 + $0x1c8] sm:$0xf0] }
 0x131   :  { %v1092_v1 = vor.u32 %v1228_v57, %v1089_v63 }
 0x132   :  { %v312_v35 = vmul.f32 %v1339_v18, %v1339_v18 }
 0x133   :  { %605 = vmatpush.bf16.msra.mxu1 %v1092_v1 }
 0x136   :  { %v279_v24 = vpop.f32.mrf.mxu3 }
 0x137   :  { %v267_v27 = vpop.f32.mrf.mxu1  ;;  %v280_v39 = vadd.f32 %v279_v24, %v244_v23  ;;  %v1207_v24 = vld [vmem:[#allocation2 + $0x114] sm:$0xf0]  ;;  %606 = vmatpush.bf16.msra.mxu1 %v1084_v22 }
 0x138   :  { %v1342_v32 = vadd.f32 %v267_v27, %v243_v3  ;;  %v1209_v3 = vld [vmem:[#allocation2 + $0x124] sm:$0xf0] }
 0x139   :  { %v1350_v58 = vmax.f32 %v280_v39, 0.0  ;;  %v1008_v7 = vor.u32 %v1209_v3, %v1007_v2  ;;  %v1224_v39 = vld [vmem:[#allocation2 + $0x1a4] sm:$0xf]  ;;  %v1055_v3 = vld [vmem:[#allocation2 + $0x180] sm:$0xf] }
 0x13a   :  { %v296_v40 = vadd.f32 %v1342_v32, %v1339_v18  ;;  %v314_v41 = vmul.f32 %v1342_v32, %v1342_v32 }
 0x13b   :  { %565 = vmatpush.bf16.msra.mxu2 %v1008_v7  ;;  %v313_v19 = vmul.f32 %v1350_v58, %v1350_v58  ;;  %v1056_v7 = vor.u32 %v1221_v4, %v1055_v3 }
 0x13c   :  { %v297_v49 = vrot.slane %v296_v40, 4  ;;  %v316_v50 = vadd.f32 %v314_v41, %v312_v35  ;;  %v1225_v35 = vld [vmem:[#allocation2 + $0x1a4] sm:$0xf0] }
 0x13d   :  { %v1072_v38 = vor.u32 %v1225_v35, %v1071_v34 }
 0x13e   :  { %v298_v59 = vadd.f32 %v297_v49, %v296_v40  ;;  %v317_v60 = vrot.slane %v316_v50, 4  ;;  %v281_v61 = vpop.f32.mrf.mxu3  ;;  %v1073_v40 = vld [vmem:[#allocation2 + $0x1a8] sm:$0xf0]  ;;  %v1204_v49 = vld [vmem:[#allocation2 + $0x104] sm:$0xf] }
 0x13f   :  { %v282_v0 = vadd.f32 %v281_v61, %v244_v23  ;;  %v999_v23 = vld [vmem:[#allocation2 + $0x110] sm:$0xf]  ;;  %v1076_v43 = vor.u32 %v1224_v39, %v1073_v40  ;;  %579 = vmatpush.bf16.msrb.mxu3 %v1072_v38  ;;  %v1222_v61 = vld [vmem:[#allocation2 + $0x194] sm:$0xf] }
 0x140   :  { %v299_v5 = vrot.slane %v298_v59, 2  ;;  %v318_v6 = vadd.f32 %v317_v60, %v316_v50  ;;  %v1000_v28 = vor.u32 %v1207_v24, %v999_v23  ;;  %v993_v50 = vld [vmem:[#allocation2 + $0x108] sm:$0xf0]  ;;  %v1064_v60 = vor.u32 %v1223_v56, %v1063_v54 }
 0x141   :  { %v1352_v9 = vmax.f32 %v282_v0, 0.0  ;;  %607 = vmatpush.bf16.msra.mxu1 %v1076_v43  ;;  %v996_v53 = vor.u32 %v1204_v49, %v993_v50  ;;  %v1068_v1 = vor.u32 %v1222_v61, %v1065_v62 }
 0x142   :  { %v300_v13 = vadd.f32 %v299_v5, %v298_v59  ;;  %v319_v14 = vrot.slane %v318_v6, 2  ;;  %566 = vmatpush.bf16.msra.mxu2 %v1000_v28 }
 0x143   :  { %v303_v20 = vadd.f32 %v1352_v9, %v1350_v58  ;;  %v315_v21 = vmul.f32 %v1352_v9, %v1352_v9  ;;  %595 = vmatpush.bf16.msrb.mxu0 %v996_v53  ;;  %580 = vmatpush.bf16.msrb.mxu3 %v1064_v60 }
 0x144   :  { %v301_v26 = vrot.slane %v300_v13, 1  ;;  %v320_v27 = vadd.f32 %v319_v14, %v318_v6 }
 0x145   :  { %v304_v30 = vrot.slane %v303_v20, 4  ;;  %v323_v31 = vadd.f32 %v315_v21, %v313_v19  ;;  %608 = vmatpush.bf16.msra.mxu1 %v1068_v1 }
 0x146   :  { %v302_v36 = vadd.f32 %v301_v26, %v300_v13  ;;  %v321_v37 = vrot.slane %v320_v27, 1  ;;  %567 = vmatpush.bf16.msra.mxu2 %v992_v48 }
 0x147   :  { %v305_v41 = vadd.f32 %v304_v30, %v303_v20  ;;  %v324_v42 = vrot.slane %v323_v31, 4  ;;  %581 = vmatpush.bf16.msrb.mxu3 %v1056_v7  ;;  %v987_v30 = vld [vmem:[%s1427_s3 + $0x5] ss:$8 sm:$0x3] }
 0x148   :  { %v1360_v46 = vmul.f32 0.0625, %v302_v36  ;;  %v322_v47 = vadd.f32 %v321_v37, %v320_v27  ;;  %v986_v27 = vld [vmem:[%s1427_s3 + $0x3] ss:$8 sm:$0x3]  ;;  %v380_v40 = vperm.slane %v987_v30, 0  ;;  %v381_v56 = vperm.slane %v987_v30, 1 }
 0x149   :  { %v306_v51 = vrot.slane %v305_v41, 2  ;;  %v325_v52 = vadd.f32 %v324_v42, %v323_v31  ;;  %609 = vmatpush.bf16.msra.mxu1 %v1060_v12  ;;  %v369_v35 = vperm.slane %v986_v27, 0  ;;  %v1184_v12 = vld [vmem:[#allocation2 + $0x2f0] sm:$0xf]  ;;  %v1148_v30 = vld [vmem:[#allocation2 + $0x260] sm:$0xf] }
 0x14a   :  { %v330_v57 = vmul.f32 0.0625, %v322_v47  ;;  %v332_v59 = vmul.f32 %v1360_v46, %v1360_v46  ;;  %v338_v31 = vsub.f32 %v1342_v32, %v1360_v46  ;;  %v336_v34 = vsub.f32 %v1339_v18, %v1360_v46 }
 0x14b   :  { %v307_v63 = vadd.f32 %v306_v51, %v305_v41  ;;  %v326_v0 = vrot.slane %v325_v52, 2  ;;  %v370_v46 = vperm.slane %v986_v27, 1 }
 0x14c   :  { %v334_v2 = vsub.f32 %v330_v57, %v332_v59 }
 0x14d   :  { %v308_v5 = vrot.slane %v307_v63, 1  ;;  %v327_v6 = vadd.f32 %v326_v0, %v325_v52 }
 0x14e   :  { %v340_v11 = vadd.f32 1e-05, %v334_v2 }
 0x14f   :  { %v309_v13 = vadd.f32 %v308_v5, %v307_v63  ;;  %v328_v14 = vrot.slane %v327_v6, 1 }
 0x150   :  { %1256 = vrsqrt.f32 %v340_v11  ;;  %vm348_vm2 = vweird.f32 %v340_v11 }
 0x151   :  { %v311_v15 = vmul.f32 0.0625, %v309_v13  ;;  %v329_v16 = vadd.f32 %v328_v14, %v327_v6  ;;  %v1251_v13 = vld [vmem:[#allocation2 + $0x2f4] sm:$0xf0] }
 0x152   :  { %v1185_v14 = vor.u32 %v1251_v13, %v1184_v12  ;;  %v1245_v13 = vld [vmem:[#allocation2 + $0x294] sm:$0xf0] }
 0x153   :  { %v331_v17 = vmul.f32 0.0625, %v329_v16  ;;  %v333_v19 = vmul.f32 %v311_v15, %v311_v15  ;;  %v337_v50 = vsub.f32 %v1350_v58, %v311_v15  ;;  %v339_v18 = vsub.f32 %v1352_v9, %v311_v15  ;;  %v988_v15 = vld [vmem:[%s1427_s3 + $0x1] ss:$8 sm:$0x3] }
 0x155   :  { %v335_v20 = vsub.f32 %v331_v17, %v333_v19  ;;  %v1180_v17 = vld [vmem:[#allocation2 + $0x2e0] sm:$0xf]  ;;  %v1250_v19 = vld [vmem:[#allocation2 + $0x2e4] sm:$0xf0] }
 0x156   :  { %v1257_v21 = vpop.eup %1256 }
 0x157   :  { %v343_v22 = vmul.f32 %v1257_v21, %v340_v11  ;;  %v341_v23 = vadd.f32 1e-05, %v335_v20  ;;  %vm349_vm1 = vweird.f32 %v1257_v21  ;;  %v620_v20 = vperm.slane %v988_v15, 1 }
 0x158   :  { %vm350_vm3 = vmor %vm348_vm2, %vm349_vm1 }
 0x159   :  { %v344_v24 = vmul.f32 %v1257_v21, %v343_v22  ;;  %1258 = vrsqrt.f32 %v341_v23  ;;  %vm358_vm5 = vweird.f32 %v341_v23  ;;  %v1152_v22 = vld [vmem:[#allocation2 + $0x270] sm:$0xf] }
 0x15b   :  { %v345_v25 = vmul.f32 0.5, %v344_v24 }
 0x15d   :  { %v346_v26 = vsub.f32 1.5, %v345_v25  ;;  %v1176_v25 = vld [vmem:[#allocation2 + $0x2d0] sm:$0xf] }
 0x15f   :  { %v1259_v28 = vpop.eup %1258  ;;  %v347_v29 = vmul.f32 %v1257_v21, %v346_v26  ;;  %v1249_v26 = vld [vmem:[#allocation2 + $0x2d4] sm:$0xf0] }
 0x160   :  { %v353_v33 = vmul.f32 %v1259_v28, %v341_v23  ;;  %vm359_vm4 = vweird.f32 %v1259_v28  ;;  %v1243_v23 = vld [vmem:[#allocation2 + $0x274] sm:$0xf0] }
 0x161   :  { %v351_v36 = vsel %vm350_vm3, %v1257_v21, %v347_v29  ;;  %vm360_vm6 = vmor %vm358_vm5, %vm359_vm4  ;;  %v1181_v21 = vor.u32 %v1250_v19, %v1180_v17  ;;  %v1153_v24 = vor.u32 %v1243_v23, %v1152_v22  ;;  %v1238_v17 = vld [vmem:[#allocation2 + $0x224] sm:$0xf0] }
 0x162   :  { %v364_v37 = vmul.f32 %v351_v36, %v338_v31  ;;  %v354_v38 = vmul.f32 %v1259_v28, %v353_v33  ;;  %v362_v39 = vmul.f32 %v351_v36, %v336_v34  ;;  %v1242_v31 = vld [vmem:[#allocation2 + $0x264] sm:$0xf0]  ;;  %v619_v34 = vperm.slane %v988_v15, 0  ;;  %v1172_v36 = vld [vmem:[#allocation2 + $0x2c0] sm:$0xf] }
 0x163   :  { %v1149_v33 = vor.u32 %v1242_v31, %v1148_v30  ;;  %v1128_v31 = vld [vmem:[#allocation2 + $0x210] sm:$0xf] }
 0x164   :  { %v355_v41 = vmul.f32 0.5, %v354_v38  ;;  %v373_v42 = vmul.f32 %v369_v35, %v362_v39  ;;  %v375_v43 = vmul.f32 %v369_v35, %v364_v37  ;;  %v1248_v37 = vld [vmem:[#allocation2 + $0x2c4] sm:$0xf0] }
 0x166   :  { %v356_v44 = vsub.f32 1.5, %v355_v41  ;;  %v384_v45 = vadd.f32 %v380_v40, %v373_v42  ;;  %v386_v47 = vadd.f32 %v380_v40, %v375_v43  ;;  %v1173_v40 = vor.u32 %v1248_v37, %v1172_v36  ;;  %v1144_v41 = vld [vmem:[#allocation2 + $0x250] sm:$0xf]  ;;  %v1241_v42 = vld [vmem:[#allocation2 + $0x254] sm:$0xf0] }
 0x168   :  { %v357_v48 = vmul.f32 %v1259_v28, %v356_v44  ;;  %v388_v32 = vmax.f32 %v384_v45, 0.0  ;;  %v390_v49 = vmax.f32 %v386_v47, 0.0  ;;  %v1145_v44 = vor.u32 %v1241_v42, %v1144_v41  ;;  %v1168_v47 = vld [vmem:[#allocation2 + $0x2b0] sm:$0xf]  ;;  %v1124_v42 = vld [vmem:[#allocation2 + $0x200] sm:$0xf] }
 0x16a   :  { %v361_v51 = vsel %vm360_vm6, %v1259_v28, %v357_v48  ;;  %v396_v52 = vpack.c.bf16 %v390_v49, %v388_v32  ;;  %v1177_v28 = vor.u32 %v1249_v26, %v1176_v25  ;;  %v1247_v48 = vld [vmem:[#allocation2 + $0x2b4] sm:$0xf0]  ;;  %v1244_v25 = vld [vmem:[#allocation2 + $0x284] sm:$0xf0] }
 0x16b   :  { %v363_v53 = vmul.f32 %v361_v51, %v337_v50  ;;  %v365_v54 = vmul.f32 %v361_v51, %v339_v18  ;;  %v1169_v18 = vor.u32 %v1247_v48, %v1168_v47  ;;  %v1140_v51 = vld [vmem:[#allocation2 + $0x240] sm:$0xf] }
 0x16c   :  { %568 = vmatmul.bf16.vlgmr.msra.gmra.mxu2 %v396_v52  ;;  %596 = vmatmul.bf16.vlgmr.msrb.gmra.mxu0 %v396_v52  ;;  %v1240_v52 = vld [vmem:[#allocation2 + $0x244] sm:$0xf0] }
 0x16d   :  { %v374_v57 = vmul.f32 %v370_v46, %v363_v53  ;;  %v376_v59 = vmul.f32 %v370_v46, %v365_v54 }
 0x16f   :  { %v385_v60 = vadd.f32 %v381_v56, %v374_v57  ;;  %v387_v61 = vadd.f32 %v381_v56, %v376_v59  ;;  %v1141_v57 = vor.u32 %v1240_v52, %v1140_v51 }
 0x171   :  { %v397_v62 = vpack.c.bf16 %v387_v61, %v385_v60  ;;  %v1164_v60 = vld [vmem:[#allocation2 + $0x2a0] sm:$0xf]  ;;  %v1246_v61 = vld [vmem:[#allocation2 + $0x2a4] sm:$0xf0] }
 0x173   :  { %582 = vmatmul.bf16.vlgmr.msrb.gmra.mxu3 %v397_v62  ;;  %610 = vmatmul.bf16.vlgmr.msra.gmra.mxu1 %v397_v62 }
 0x1e9   :  { %v597_v63 = vpop.f32.mrf.mxu0 }
 0x1ef   :  { %v569_v0 = vpop.f32.mrf.mxu2 }
 0x1f0   :  { %v611_v58 = vpop.f32.mrf.mxu1 }
 0x1f1   :  { %v599_v1 = vpop.f32.mrf.mxu0  ;;  %v612_v3 = vadd.f32 %v611_v58, %v597_v63 }
 0x1f6   :  { %v583_v9 = vpop.f32.mrf.mxu3 }
 0x1f7   :  { %v571_v6 = vpop.f32.mrf.mxu2  ;;  %v584_v8 = vadd.f32 %v583_v9, %v569_v0  ;;  %v1165_v9 = vor.u32 %v1246_v61, %v1164_v60 }
 0x1f8   :  { %v613_v2 = vpop.f32.mrf.mxu1 }
 0x1f9   :  { %v614_v4 = vadd.f32 %v613_v2, %v599_v1  ;;  %v1136_v1 = vld [vmem:[#allocation2 + $0x230] sm:$0xf]  ;;  %v1239_v2 = vld [vmem:[#allocation2 + $0x234] sm:$0xf0] }
 0x1fb   :  { %v617_v5 = vpack.c.bf16 %v614_v4, %v612_v3 }
 0x1fd   :  { %644 = vmatpush.bf16.msra.mxu3 %v617_v5 }
 0x1fe   :  { %v585_v7 = vpop.f32.mrf.mxu3 }
 0x1ff   :  { %v586_v10 = vadd.f32 %v585_v7, %v571_v6  ;;  %v1137_v7 = vor.u32 %v1239_v2, %v1136_v1  ;;  %v1120_v1 = vld [vmem:[%s1427_s3 + $0x6] ss:$8 sm:$0x3] }
 0x200   :  { %1118 = vmatmul.msk.bf16.vlgmr.msra.gmra.mxu3 %vm252_vm0, %v1327_v55 }
 0x201   :  { %v616_v11 = vpack.c.bf16 %v586_v10, %v584_v8  ;;  %873 = vmatpush.bf16.msrb.mxu3 %v1185_v14  ;;  %v1160_v8 = vld [vmem:[#allocation2 + $0x290] sm:$0xf] }
 0x202   :  { %v1161_v15 = vor.u32 %v1245_v13, %v1160_v8  ;;  %v744_v8 = vperm.slane %v1120_v1, 1 }
 0x203   :  { %630 = vmatpush.bf16.msrb.mxu2 %v616_v11 }
 0x205   :  { %874 = vmatpush.bf16.msrb.mxu3 %v1181_v21 }
 0x206   :  { %1117 = vmatmul.msk.bf16.vlgmr.msrb.gmra.mxu2 %vm252_vm0, %v1327_v55 }
 0x207   :  { %859 = vmatpush.bf16.msra.mxu2 %v1153_v24  ;;  %v1156_v24 = vld [vmem:[#allocation2 + $0x280] sm:$0xf] }
 0x209   :  { %875 = vmatpush.bf16.msrb.mxu3 %v1177_v28 }
 0x20b   :  { %860 = vmatpush.bf16.msra.mxu2 %v1149_v33  ;;  %v1237_v33 = vld [vmem:[#allocation2 + $0x214] sm:$0xf0] }
 0x20c   :  { %v1129_v37 = vor.u32 %v1237_v33, %v1128_v31 }
 0x20d   :  { %876 = vmatpush.bf16.msrb.mxu3 %v1173_v40 }
 0x20f   :  { %861 = vmatpush.bf16.msra.mxu2 %v1145_v44  ;;  %v1236_v44 = vld [vmem:[#allocation2 + $0x204] sm:$0xf0] }
 0x211   :  { %877 = vmatpush.bf16.msrb.mxu3 %v1169_v18 }
 0x213   :  { %862 = vmatpush.bf16.msra.mxu2 %v1141_v57 }
 0x215   :  { %878 = vmatpush.bf16.msrb.mxu3 %v1165_v9 }
 0x217   :  { %863 = vmatpush.bf16.msra.mxu2 %v1137_v7 }
 0x219   :  { %879 = vmatpush.bf16.msrb.mxu3 %v1161_v15 }
 0x283   :  { %v646_v16 = vpop.f32.mrf.mxu3 }
 0x284   :  { %v647_v27 = vadd.f32 %v646_v16, %v620_v20  ;;  %v1132_v16 = vld [vmem:[#allocation2 + $0x220] sm:$0xf] }
 0x285   :  { %v1133_v22 = vor.u32 %v1238_v17, %v1132_v16 }
 0x286   :  { %v1383_v38 = vmax.f32 %v647_v27, 0.0 }
 0x287   :  { %864 = vmatpush.bf16.msra.mxu2 %v1133_v22 }
 0x288   :  { %v676_v32 = vmul.f32 %v1383_v38, %v1383_v38 }
 0x289   :  { %v632_v29 = vpop.f32.mrf.mxu2 }
 0x28a   :  { %v1387_v45 = vadd.f32 %v632_v29, %v619_v34  ;;  %v1157_v29 = vor.u32 %v1244_v25, %v1156_v24 }
 0x28b   :  { %v648_v35 = vpop.f32.mrf.mxu3  ;;  %865 = vmatpush.bf16.msra.mxu2 %v1129_v37 }
 0x28c   :  { %v649_v39 = vadd.f32 %v648_v35, %v620_v20  ;;  %v675_v59 = vmul.f32 %v1387_v45, %v1387_v45  ;;  %880 = vmatpush.bf16.msrb.mxu3 %v1157_v29 }
 0x28e   :  { %v1385_v43 = vmax.f32 %v649_v39, 0.0 }
 0x290   :  { %v666_v49 = vadd.f32 %v1385_v43, %v1383_v38  ;;  %v678_v50 = vmul.f32 %v1385_v43, %v1385_v43 }
 0x291   :  { %v634_v46 = vpop.f32.mrf.mxu2 }
 0x292   :  { %v667_v53 = vrot.slane %v666_v49, 4  ;;  %v686_v54 = vadd.f32 %v678_v50, %v676_v32  ;;  %v1395_v56 = vadd.f32 %v634_v46, %v619_v34  ;;  %v1125_v32 = vor.u32 %v1236_v44, %v1124_v42 }
 0x294   :  { %v668_v62 = vadd.f32 %v667_v53, %v666_v49  ;;  %v687_v63 = vrot.slane %v686_v54, 4  ;;  %v659_v58 = vadd.f32 %v1395_v56, %v1387_v45  ;;  %v677_v0 = vmul.f32 %v1395_v56, %v1395_v56  ;;  %866 = vmatpush.bf16.msra.mxu2 %v1125_v32 }
 0x296   :  { %v669_v3 = vrot.slane %v668_v62, 2  ;;  %v688_v4 = vadd.f32 %v687_v63, %v686_v54  ;;  %v660_v5 = vrot.slane %v659_v58, 4  ;;  %v679_v6 = vadd.f32 %v677_v0, %v675_v59  ;;  %v1119_v0 = vld [vmem:[%s1427_s3 + $0x4] ss:$8 sm:$0x3] }
 0x298   :  { %v670_v10 = vadd.f32 %v669_v3, %v668_v62  ;;  %v689_v11 = vrot.slane %v688_v4, 2  ;;  %v661_v12 = vadd.f32 %v660_v5, %v659_v58  ;;  %v680_v14 = vrot.slane %v679_v6, 4 }
 0x299   :  { %v733_v5 = vperm.slane %v1119_v0, 1 }
 0x29a   :  { %v671_v19 = vrot.slane %v670_v10, 1  ;;  %v690_v20 = vadd.f32 %v689_v11, %v688_v4  ;;  %v662_v21 = vrot.slane %v661_v12, 2  ;;  %v681_v23 = vadd.f32 %v680_v14, %v679_v6 }
 0x29c   :  { %v672_v26 = vadd.f32 %v671_v19, %v670_v10  ;;  %v691_v27 = vrot.slane %v690_v20, 1  ;;  %v663_v28 = vadd.f32 %v662_v21, %v661_v12  ;;  %v682_v30 = vrot.slane %v681_v23, 2 }
 0x29e   :  { %v674_v34 = vmul.f32 0.0625, %v672_v26  ;;  %v692_v35 = vadd.f32 %v691_v27, %v690_v20  ;;  %v664_v36 = vrot.slane %v663_v28, 1  ;;  %v683_v39 = vadd.f32 %v682_v30, %v681_v23 }
 0x29f   :  { %v743_v23 = vperm.slane %v1120_v1, 0 }
 0x2a0   :  { %v694_v40 = vmul.f32 0.0625, %v692_v35  ;;  %v696_v41 = vmul.f32 %v674_v34, %v674_v34  ;;  %v665_v47 = vadd.f32 %v664_v36, %v663_v28  ;;  %v684_v48 = vrot.slane %v683_v39, 1 }
 0x2a1   :  { %v700_v3 = vsub.f32 %v1383_v38, %v674_v34  ;;  %v702_v4 = vsub.f32 %v1385_v43, %v674_v34  ;;  %v732_v38 = vperm.slane %v1119_v0, 0 }
 0x2a2   :  { %v698_v49 = vsub.f32 %v694_v40, %v696_v41  ;;  %v673_v50 = vmul.f32 0.0625, %v665_v47  ;;  %v685_v18 = vadd.f32 %v684_v48, %v683_v39  ;;  %v1121_v39 = vld [vmem:[%s1427_s3 + $0x2] ss:$8 sm:$0x3] }
 0x2a3   :  { %v889_v40 = vperm.slane %v1121_v39, 0 }
 0x2a4   :  { %v704_v46 = vadd.f32 1e-05, %v698_v49  ;;  %v693_v51 = vmul.f32 0.0625, %v685_v18  ;;  %v695_v52 = vmul.f32 %v673_v50, %v673_v50  ;;  %v699_v16 = vsub.f32 %v1387_v45, %v673_v50 }
 0x2a5   :  { %v701_v17 = vsub.f32 %v1395_v56, %v673_v50 }
 0x2a6   :  { %1260 = vrsqrt.f32 %v704_v46  ;;  %v697_v53 = vsub.f32 %v693_v51, %v695_v52  ;;  %vm721_vm8 = vweird.f32 %v704_v46 }
 0x2a8   :  { %v703_v54 = vadd.f32 1e-05, %v697_v53 }
 0x2aa   :  { %1262 = vrsqrt.f32 %v703_v54  ;;  %vm711_vm11 = vweird.f32 %v703_v54 }
 0x2ac   :  { %v1261_v57 = vpop.eup %1260 }
 0x2ad   :  { %v716_v59 = vmul.f32 %v1261_v57, %v704_v46  ;;  %vm722_vm7 = vweird.f32 %v1261_v57 }
 0x2ae   :  { %vm723_vm9 = vmor %vm721_vm8, %vm722_vm7 }
 0x2af   :  { %v717_v60 = vmul.f32 %v1261_v57, %v716_v59 }
 0x2b0   :  { %v1263_v61 = vpop.eup %1262 }
 0x2b1   :  { %v718_v62 = vmul.f32 0.5, %v717_v60  ;;  %v706_v63 = vmul.f32 %v1263_v61, %v703_v54  ;;  %vm712_vm10 = vweird.f32 %v1263_v61 }
 0x2b2   :  { %vm713_vm12 = vmor %vm711_vm11, %vm712_vm10 }
 0x2b3   :  { %v719_v58 = vsub.f32 1.5, %v718_v62  ;;  %v707_v9 = vmul.f32 %v1263_v61, %v706_v63 }
 0x2b5   :  { %v720_v2 = vmul.f32 %v1261_v57, %v719_v58  ;;  %v708_v6 = vmul.f32 0.5, %v707_v9 }
 0x2b7   :  { %v724_v7 = vsel %vm723_vm9, %v1261_v57, %v720_v2  ;;  %v709_v12 = vsub.f32 1.5, %v708_v6 }
 0x2b8   :  { %v726_v10 = vmul.f32 %v724_v7, %v700_v3  ;;  %v728_v11 = vmul.f32 %v724_v7, %v702_v4 }
 0x2b9   :  { %v710_v14 = vmul.f32 %v1263_v61, %v709_v12 }
 0x2ba   :  { %v739_v13 = vmul.f32 %v733_v5, %v728_v11  ;;  %v737_v15 = vmul.f32 %v733_v5, %v726_v10 }
 0x2bb   :  { %v714_v43 = vsel %vm713_vm12, %v1263_v61, %v710_v14 }
 0x2bc   :  { %v748_v19 = vadd.f32 %v744_v8, %v737_v15  ;;  %v750_v20 = vadd.f32 %v744_v8, %v739_v13  ;;  %v725_v21 = vmul.f32 %v714_v43, %v699_v16  ;;  %v727_v22 = vmul.f32 %v714_v43, %v701_v17 }
 0x2be   :  { %v760_v24 = vpack.c.bf16 %v750_v20, %v748_v19  ;;  %v736_v25 = vmul.f32 %v732_v38, %v725_v21  ;;  %v738_v26 = vmul.f32 %v732_v38, %v727_v22 }
 0x2c0   :  { %881 = vmatmul.bf16.vlgmr.msrb.gmra.mxu3 %v760_v24  ;;  %v747_v27 = vadd.f32 %v743_v23, %v736_v25  ;;  %v749_v28 = vadd.f32 %v743_v23, %v738_v26 }
 0x2c2   :  { %v751_v29 = vmax.f32 %v747_v27, 0.0  ;;  %v753_v30 = vmax.f32 %v749_v28, 0.0 }
 0x2c4   :  { %v759_v31 = vpack.c.bf16 %v753_v30, %v751_v29 }
 0x2c6   :  { %867 = vmatmul.bf16.vlgmr.msra.gmra.mxu2 %v759_v31 }
 0x343   :  { %v882_v45 = vpop.f32.mrf.mxu3 }
 0x349   :  { %v868_v56 = vpop.f32.mrf.mxu2 }
 0x34a   :  { %v883_v35 = vadd.f32 %v882_v45, %v868_v56 }
 0x34b   :  { %v884_v33 = vpop.f32.mrf.mxu3 }
 0x351   :  { %v870_v34 = vpop.f32.mrf.mxu2 }
 0x352   :  { %v885_v36 = vadd.f32 %v884_v33, %v870_v34 }
 0x354   :  { %v887_v37 = vpack.c.bf16 %v885_v36, %v883_v35 }
 0x356   :  { %898 = vmatpush.bf16.msra.mxu0 %v887_v37 }
 0x359   :  { %1186 = vmatmul.msk.bf16.vlgmr.msra.gmra.mxu0 %vm252_vm0, %v1327_v55 }
 0x3d6   :  { %v900_v41 = vpop.f32.mrf.mxu0 }
 0x3d7   :  { %v901_v42 = vadd.f32 %v900_v41, %v889_v40 }
 0x3d9   :  { %905 = vst [vmem:[%s1428_s4] sm:$0xff] %v901_v42 }
 0x3de   :  { %v902_v44 = vpop.f32.mrf.mxu0 }
 0x3df   :  { %v903_v47 = vadd.f32 %v902_v44, %v889_v40 }
 0x3e1   :  { %906 = vst [vmem:[%s1428_s4 + $0x8] sm:$0xff] %v903_v47 }
 0x3e2   :  { %911 = vsyncpa [#allocation3], 1 }

</bundles_post_ra>
